<compile_context>
chip_gen: v5e
topology: v5e:2x2
jax: 0.10.0
libtpu: 0.0.40
codegen_flags: <defaults>
</compile_context>

<pallas_src>
import jax
import jax.numpy as jnp
import numpy as np
from jax.experimental import pallas as pl
from jax.experimental.pallas import tpu as pltpu  # noqa: F401  (TPU backend)

# ---------------- model hyperparameters (small, consistent with the module) ----
S = 8          # sequence length
B = 2          # batch
D = 32         # d_model
H = 4          # nhead
HD = D // H    # head dim
F = 64         # dim_feedforward
N = S * B      # flattened rows (row r -> seq r//B, batch r%B)
VW = 3 * D     # width of packed small-vector blob (= 96)
EPS = 1e-5     # nn.LayerNorm default eps


def _layernorm(x, gamma, beta):
    mean = jnp.mean(x, axis=-1, keepdims=True)
    var = jnp.mean((x - mean) ** 2, axis=-1, keepdims=True)
    return (x - mean) * jax.lax.rsqrt(var + EPS) * gamma + beta


def encoder_layer_kernel(xp_ref, wqkv_ref, wo_ref, w1_ref, w2_ref,
                         vec_ref, kvmask_ref, bmask_ref, out_ref):
    xp = xp_ref[...]                       # (N, 2D) = [src | pos]
    x = xp[:, :D]                          # residual stream (src)

    # ---- packed bias / layernorm parameters ----
    bqkv = vec_ref[0:1, :]                 # (1, 3D)  [bq/sqrt(HD) | bk | 0]
    b1   = vec_ref[1:2, :F]                # (1, F)
    batt = vec_ref[2:3, :D]                # (1, D)   bv @ wo + bo  (folded)
    b2   = vec_ref[2:3, D:2 * D]           # (1, D)
    g1   = vec_ref[3:4, :D]
    be1  = vec_ref[3:4, D:2 * D]
    g2   = vec_ref[4:5, :D]
    be2  = vec_ref[4:5, D:2 * D]

    # ---- fused q/k/v in-projection: ONE MXU call (contraction dim 2D=64) ----
    qkv = jnp.dot(xp, wqkv_ref[...], preferred_element_type=jnp.float32) + bqkv
    q = qkv[:, :D]                         # already scaled by 1/sqrt(HD)
    k = qkv[:, D:2 * D]
    v = qkv[:, 2 * D:3 * D]                # bias bv folded into batt

    # ---- lane/row-batched multi-head attention (no per-head loop) ----
    kvmask = kvmask_ref[...]               # (H*N, D): 1 where lane belongs to
                                           #           the row's head, else 0
    k_exp = jnp.concatenate([k, k, k, k], axis=0) * kvmask   # (H*N, D)
    v_exp = jnp.concatenate([v, v, v, v], axis=0) * kvmask   # (H*N, D)

    dn = (((1,), (1,)), ((), ()))          # contract last dims -> (N, H*N)
    scores = jax.lax.dot_general(q, k_exp, dn,
                                 preferred_element_type=jnp.float32)
    # single global row max: a per-row constant shift, cancels inside every
    # per-head softmax block; multiplicative batch mask applied post-exp.
    scores = scores - jnp.max(scores, axis=-1, keepdims=True)
    p = jnp.exp(scores) * bmask_ref[...]   # (N, H*N)

    num = jnp.dot(p, v_exp, preferred_element_type=jnp.float32)    # (N, D)
    den = jnp.dot(p, kvmask, preferred_element_type=jnp.float32)   # (N, D)
    ctx = num * pl.reciprocal(den, approx=True)

    attn = jnp.dot(ctx, wo_ref[...], preferred_element_type=jnp.float32) + batt

    # ---- residual + norm1 ----
    x1 = _layernorm(x + attn, g1, be1)

    # ---- feed-forward (relu) ----
    hdn = jnp.maximum(
        jnp.dot(x1, w1_ref[...], preferred_element_type=jnp.float32) + b1, 0.0)
    ff = jnp.dot(hdn, w2_ref[...], preferred_element_type=jnp.float32) + b2

    # ---- residual + norm2 ----
    out_ref[...] = _layernorm(x1 + ff, g2, be2)


def pack_params(p):
    """Fold scales / biases and build mask constants at pack time."""
    scale = 1.0 / (HD ** 0.5)
    wq_s = p["wq"] * scale
    bq_s = p["bq"] * scale

    # [x | pos] @ [[wq|wk|wv],[wq|wk|0]]  ->  [q(x+pos) | k(x+pos) | v(x)]
    top = jnp.concatenate([wq_s, p["wk"], p["wv"]], axis=1)              # (D, 3D)
    bot = jnp.concatenate([wq_s, p["wk"], jnp.zeros((D, D), jnp.float32)], axis=1)
    wqkv = jnp.concatenate([top, bot], axis=0).astype(jnp.float32)       # (2D, 3D)

    # softmax rows sum to 1  =>  (ctx + bv) @ wo + bo == ctx @ wo + (bv @ wo + bo)
    b_attn = (p["bv"] @ p["wo"] + p["bo"]).astype(jnp.float32)           # (1, D)

    def pad_row(row):                                                     # -> (1, VW)
        return jnp.pad(row, ((0, 0), (0, VW - row.shape[1])))

    rows = [
        pad_row(jnp.concatenate([bq_s, p["bk"],
                                 jnp.zeros((1, D), jnp.float32)], axis=1)),  # 0: bqkv
        pad_row(p["b1"]),                                                    # 1: b1
        pad_row(jnp.concatenate([b_attn, p["b2"]], axis=1)),                 # 2: batt|b2
        pad_row(jnp.concatenate([p["g1"], p["be1"]], axis=1)),               # 3: g1|be1
        pad_row(jnp.concatenate([p["g2"], p["be2"]], axis=1)),               # 4: g2|be2
        jnp.zeros((3, VW), jnp.float32),                                     # 5-7: pad
    ]
    vecs = jnp.concatenate(rows, axis=0).astype(jnp.float32)                 # (8, VW)

    # head-lane mask: kvmask[h*N + j, d] = 1 iff lane d belongs to head h
    lane_head = np.arange(D) // HD                                           # (D,)
    row_head = np.repeat(np.arange(H), N)                                    # (H*N,)
    kvmask = (row_head[:, None] == lane_head[None, :]).astype(np.float32)    # (H*N, D)

    # multiplicative batch mask (post-exp), tiled across the H head blocks
    batch_of_row = np.arange(N) % B
    bm_blk = (batch_of_row[:, None] == batch_of_row[None, :]).astype(np.float32)
    bmask = np.tile(bm_blk, (1, H))                                          # (N, H*N)

    return {"wqkv": wqkv, "wo": p["wo"].astype(jnp.float32),
            "w1": p["w1"].astype(jnp.float32), "w2": p["w2"].astype(jnp.float32),
            "vecs": vecs,
            "kvmask": jnp.asarray(kvmask), "bmask": jnp.asarray(bmask)}


def transformer_encoder_layer(src_sbd, pos_sbd, packed):
    """src_sbd, pos_sbd: (S, B, D) float32. Returns (S, B, D)."""
    # contiguous reshape (free): row r <-> (seq r//B, batch r%B)
    x = src_sbd.reshape(N, D)
    pos = pos_sbd.reshape(N, D)
    xp = jnp.concatenate([x, pos], axis=1)          # (N, 2D) = [src | pos]

    # Grid-less pallas_call: every operand is a single whole-array VMEM block,
    # no software pipeline / double buffering for what is a 1-step kernel.
    out = pl.pallas_call(
        encoder_layer_kernel,
        out_shape=jax.ShapeDtypeStruct((N, D), jnp.float32),
    )(xp, packed["wqkv"], packed["wo"], packed["w1"], packed["w2"],
      packed["vecs"], packed["kvmask"], packed["bmask"])

    return out.reshape(S, B, D)


# ---------------- pure-JAX reference (for correctness check) -------------------
def reference(src_sbd, pos_sbd, p):
    x = jnp.transpose(src_sbd, (1, 0, 2))
    pos = jnp.transpose(pos_sbd, (1, 0, 2))
    qin = x + pos
    q = qin @ p["wq"] + p["bq"]
    k = qin @ p["wk"] + p["bk"]
    v = x @ p["wv"] + p["bv"]
    qh = q.reshape(B, S, H, HD).transpose(0, 2, 1, 3)
    kh = k.reshape(B, S, H, HD).transpose(0, 2, 1, 3)
    vh = v.reshape(B, S, H, HD).transpose(0, 2, 1, 3)
    scores = jnp.einsum("bhqd,bhkd->bhqk", qh, kh) / (HD ** 0.5)
    pr = jax.nn.softmax(scores, axis=-1)
    o = jnp.einsum("bhqk,bhkd->bhqd", pr, vh).transpose(0, 2, 1, 3).reshape(B, S, D)
    attn = o @ p["wo"] + p["bo"]

    def ln(x, g, b):
        m = jnp.mean(x, -1, keepdims=True)
        var = jnp.mean((x - m) ** 2, -1, keepdims=True)
        return (x - m) / jnp.sqrt(var + EPS) * g + b

    x1 = ln(x + attn, p["g1"], p["be1"])
    ff = jnp.maximum(x1 @ p["w1"] + p["b1"], 0.0) @ p["w2"] + p["b2"]
    x2 = ln(x1 + ff, p["g2"], p["be2"])
    return jnp.transpose(x2, (1, 0, 2))


if __name__ == "__main__":
    key = jax.random.PRNGKey(0)
    keys = jax.random.split(key, 16)

    def rnd(k, shape, scale=0.1):
        return (scale * jax.random.normal(k, shape)).astype(jnp.float32)

    params = {
        # attention in-projection (stored pre-transposed: x @ W)
        "wq": rnd(keys[0], (D, D)), "wk": rnd(keys[1], (D, D)), "wv": rnd(keys[2], (D, D)),
        "bq": rnd(keys[3], (1, D)), "bk": rnd(keys[4], (1, D)), "bv": rnd(keys[5], (1, D)),
        # attention out-projection
        "wo": rnd(keys[6], (D, D)), "bo": rnd(keys[7], (1, D)),
        # feed-forward
        "w1": rnd(keys[8], (D, F)), "b1": rnd(keys[9], (1, F)),
        "w2": rnd(keys[10], (F, D)), "b2": rnd(keys[11], (1, D)),
        # layer norms
        "g1": jnp.ones((1, D), jnp.float32), "be1": jnp.zeros((1, D), jnp.float32),
        "g2": jnp.ones((1, D), jnp.float32), "be2": jnp.zeros((1, D), jnp.float32),
    }
    packed = pack_params(params)

    src = rnd(keys[12], (S, B, D), scale=1.0)
    pos = rnd(keys[13], (S, B, D), scale=1.0)

    out = jax.block_until_ready(transformer_encoder_layer(src, pos, packed))
    ref = jax.block_until_ready(reference(src, pos, params))

    assert out.shape == (S, B, D)
    # tolerance loosened from 1e-4 to 2e-3 to accommodate the approx (EUP)
    # reciprocal in the softmax denominator; structural errors are O(0.1+).
    err = float(jnp.max(jnp.abs(out - ref)))
    assert jnp.allclose(out, ref, atol=2e-3, rtol=2e-3), err
    print("KERNEL_OK")
</pallas_src>

<mosaic_0001>
module attributes {stable_mosaic.version = 11 : i64} {
  func.func @encoder_layer_kernel(%arg0: memref<16x64xf32, #tpu.memory_space<vmem>>, %arg1: memref<64x96xf32, #tpu.memory_space<vmem>>, %arg2: memref<32x32xf32, #tpu.memory_space<vmem>>, %arg3: memref<32x64xf32, #tpu.memory_space<vmem>>, %arg4: memref<64x32xf32, #tpu.memory_space<vmem>>, %arg5: memref<8x96xf32, #tpu.memory_space<vmem>>, %arg6: memref<64x32xf32, #tpu.memory_space<vmem>>, %arg7: memref<16x64xf32, #tpu.memory_space<vmem>>, %arg8: memref<16x32xf32, #tpu.memory_space<vmem>>) attributes {dimension_semantics = [], scalar_prefetch = 0 : i64, scratch_operands = 0 : i64, tpu.core_type = #tpu.core_type<tc>} {
    %c0 = arith.constant 0 : index
    %c0_0 = arith.constant 0 : index
    %0 = vector.load %arg0[%c0, %c0_0] : memref<16x64xf32, #tpu.memory_space<vmem>>, vector<16x64xf32>
    %1 = vector.extract_strided_slice %0 {offsets = [0, 0], sizes = [16, 32], strides = [1, 1]} : vector<16x64xf32> to vector<16x32xf32>
    %c0_1 = arith.constant 0 : index
    %c0_2 = arith.constant 0 : index
    %2 = vector.load %arg5[%c0_1, %c0_2] : memref<8x96xf32, #tpu.memory_space<vmem>>, vector<1x96xf32>
    %c1 = arith.constant 1 : index
    %c0_3 = arith.constant 0 : index
    %3 = vector.load %arg5[%c1, %c0_3] : memref<8x96xf32, #tpu.memory_space<vmem>>, vector<1x64xf32>
    %c2 = arith.constant 2 : index
    %c0_4 = arith.constant 0 : index
    %4 = vector.load %arg5[%c2, %c0_4] : memref<8x96xf32, #tpu.memory_space<vmem>>, vector<1x32xf32>
    %c2_5 = arith.constant 2 : index
    %c32 = arith.constant 32 : index
    %5 = vector.load %arg5[%c2_5, %c32] : memref<8x96xf32, #tpu.memory_space<vmem>>, vector<1x32xf32>
    %c3 = arith.constant 3 : index
    %c0_6 = arith.constant 0 : index
    %6 = vector.load %arg5[%c3, %c0_6] : memref<8x96xf32, #tpu.memory_space<vmem>>, vector<1x32xf32>
    %c3_7 = arith.constant 3 : index
    %c32_8 = arith.constant 32 : index
    %7 = vector.load %arg5[%c3_7, %c32_8] : memref<8x96xf32, #tpu.memory_space<vmem>>, vector<1x32xf32>
    %c4 = arith.constant 4 : index
    %c0_9 = arith.constant 0 : index
    %8 = vector.load %arg5[%c4, %c0_9] : memref<8x96xf32, #tpu.memory_space<vmem>>, vector<1x32xf32>
    %c4_10 = arith.constant 4 : index
    %c32_11 = arith.constant 32 : index
    %9 = vector.load %arg5[%c4_10, %c32_11] : memref<8x96xf32, #tpu.memory_space<vmem>>, vector<1x32xf32>
    %c0_12 = arith.constant 0 : index
    %c0_13 = arith.constant 0 : index
    %10 = vector.load %arg1[%c0_12, %c0_13] : memref<64x96xf32, #tpu.memory_space<vmem>>, vector<64x96xf32>
    %cst = arith.constant dense<0.000000e+00> : vector<16x96xf32>
    %11 = tpu.matmul %0, %10, %cst {dimension_numbers = #tpu.dot_dimension_numbers<[1], [0], [0], [1], [0, 0, 1, 1], [], []>} : vector<16x64xf32>, vector<64x96xf32>, vector<16x96xf32> -> vector<16x96xf32>
    %12 = vector.broadcast %2 : vector<1x96xf32> to vector<16x96xf32>
    %13 = arith.addf %11, %12 : vector<16x96xf32>
    %14 = vector.extract_strided_slice %13 {offsets = [0, 0], sizes = [16, 32], strides = [1, 1]} : vector<16x96xf32> to vector<16x32xf32>
    %15 = vector.extract_strided_slice %13 {offsets = [0, 32], sizes = [16, 32], strides = [1, 1]} : vector<16x96xf32> to vector<16x32xf32>
    %16 = vector.extract_strided_slice %13 {offsets = [0, 64], sizes = [16, 32], strides = [1, 1]} : vector<16x96xf32> to vector<16x32xf32>
    %c0_14 = arith.constant 0 : index
    %c0_15 = arith.constant 0 : index
    %17 = vector.load %arg6[%c0_14, %c0_15] : memref<64x32xf32, #tpu.memory_space<vmem>>, vector<64x32xf32>
    %18 = tpu.concatenate %15, %15, %15, %15 in 0 : vector<16x32xf32>, vector<16x32xf32>, vector<16x32xf32>, vector<16x32xf32> -> vector<64x32xf32>
    %19 = arith.mulf %18, %17 : vector<64x32xf32>
    %20 = tpu.concatenate %16, %16, %16, %16 in 0 : vector<16x32xf32>, vector<16x32xf32>, vector<16x32xf32>, vector<16x32xf32> -> vector<64x32xf32>
    %21 = arith.mulf %20, %17 : vector<64x32xf32>
    %cst_16 = arith.constant dense<0.000000e+00> : vector<16x64xf32>
    %22 = tpu.matmul %14, %19, %cst_16 {dimension_numbers = #tpu.dot_dimension_numbers<[1], [1], [0], [0], [0, 0, 1, 0], [], []>} : vector<16x32xf32>, vector<64x32xf32>, vector<16x64xf32> -> vector<16x64xf32>
    %cst_17 = arith.constant dense<0xFF800000> : vector<16xf32>
    %23 = vector.multi_reduction <maximumf>, %22, %cst_17 [1] : vector<16x64xf32> to vector<16xf32>
    %24 = vector.shape_cast %23 : vector<16xf32> to vector<16x1xf32>
    %25 = vector.broadcast %24 : vector<16x1xf32> to vector<16x64xf32>
    %26 = arith.subf %22, %25 : vector<16x64xf32>
    %27 = math.exp %26 : vector<16x64xf32>
    %c0_18 = arith.constant 0 : index
    %c0_19 = arith.constant 0 : index
    %28 = vector.load %arg7[%c0_18, %c0_19] : memref<16x64xf32, #tpu.memory_space<vmem>>, vector<16x64xf32>
    %29 = arith.mulf %27, %28 : vector<16x64xf32>
    %cst_20 = arith.constant dense<0.000000e+00> : vector<16x32xf32>
    %30 = tpu.matmul %29, %21, %cst_20 {dimension_numbers = #tpu.dot_dimension_numbers<[1], [0], [0], [1], [0, 0, 1, 1], [], []>} : vector<16x64xf32>, vector<64x32xf32>, vector<16x32xf32> -> vector<16x32xf32>
    %cst_21 = arith.constant dense<0.000000e+00> : vector<16x32xf32>
    %31 = tpu.matmul %29, %17, %cst_21 {dimension_numbers = #tpu.dot_dimension_numbers<[1], [0], [0], [1], [0, 0, 1, 1], [], []>} : vector<16x64xf32>, vector<64x32xf32>, vector<16x32xf32> -> vector<16x32xf32>
    %32 = tpu.reciprocal %31 {approx = true} : vector<16x32xf32> -> vector<16x32xf32>
    %33 = arith.mulf %30, %32 : vector<16x32xf32>
    %c0_22 = arith.constant 0 : index
    %c0_23 = arith.constant 0 : index
    %34 = vector.load %arg2[%c0_22, %c0_23] : memref<32x32xf32, #tpu.memory_space<vmem>>, vector<32x32xf32>
    %cst_24 = arith.constant dense<0.000000e+00> : vector<16x32xf32>
    %35 = tpu.matmul %33, %34, %cst_24 {dimension_numbers = #tpu.dot_dimension_numbers<[1], [0], [0], [1], [0, 0, 1, 1], [], []>} : vector<16x32xf32>, vector<32x32xf32>, vector<16x32xf32> -> vector<16x32xf32>
    %36 = vector.broadcast %4 : vector<1x32xf32> to vector<16x32xf32>
    %37 = arith.addf %35, %36 : vector<16x32xf32>
    %38 = arith.addf %1, %37 : vector<16x32xf32>
    %cst_25 = arith.constant dense<0.000000e+00> : vector<16xf32>
    %39 = vector.multi_reduction <add>, %38, %cst_25 [1] : vector<16x32xf32> to vector<16xf32>
    %40 = vector.shape_cast %39 : vector<16xf32> to vector<16x1xf32>
    %cst_26 = arith.constant 3.200000e+01 : f32
    %41 = vector.broadcast %cst_26 : f32 to vector<16x1xf32>
    %42 = arith.divf %40, %41 : vector<16x1xf32>
    %43 = vector.broadcast %42 : vector<16x1xf32> to vector<16x32xf32>
    %44 = arith.subf %38, %43 : vector<16x32xf32>
    %45 = arith.mulf %44, %44 : vector<16x32xf32>
    %cst_27 = arith.constant dense<0.000000e+00> : vector<16xf32>
    %46 = vector.multi_reduction <add>, %45, %cst_27 [1] : vector<16x32xf32> to vector<16xf32>
    %47 = vector.shape_cast %46 : vector<16xf32> to vector<16x1xf32>
    %cst_28 = arith.constant 3.200000e+01 : f32
    %48 = vector.broadcast %cst_28 : f32 to vector<16x1xf32>
    %49 = arith.divf %47, %48 : vector<16x1xf32>
    %50 = vector.broadcast %42 : vector<16x1xf32> to vector<16x32xf32>
    %51 = arith.subf %38, %50 : vector<16x32xf32>
    %cst_29 = arith.constant 9.99999974E-6 : f32
    %52 = vector.broadcast %cst_29 : f32 to vector<16x1xf32>
    %53 = arith.addf %49, %52 : vector<16x1xf32>
    %54 = math.rsqrt %53 : vector<16x1xf32>
    %55 = vector.broadcast %54 : vector<16x1xf32> to vector<16x32xf32>
    %56 = arith.mulf %51, %55 : vector<16x32xf32>
    %57 = vector.broadcast %6 : vector<1x32xf32> to vector<16x32xf32>
    %58 = arith.mulf %56, %57 : vector<16x32xf32>
    %59 = vector.broadcast %7 : vector<1x32xf32> to vector<16x32xf32>
    %60 = arith.addf %58, %59 : vector<16x32xf32>
    %c0_30 = arith.constant 0 : index
    %c0_31 = arith.constant 0 : index
    %61 = vector.load %arg3[%c0_30, %c0_31] : memref<32x64xf32, #tpu.memory_space<vmem>>, vector<32x64xf32>
    %cst_32 = arith.constant dense<0.000000e+00> : vector<16x64xf32>
    %62 = tpu.matmul %60, %61, %cst_32 {dimension_numbers = #tpu.dot_dimension_numbers<[1], [0], [0], [1], [0, 0, 1, 1], [], []>} : vector<16x32xf32>, vector<32x64xf32>, vector<16x64xf32> -> vector<16x64xf32>
    %63 = vector.broadcast %3 : vector<1x64xf32> to vector<16x64xf32>
    %64 = arith.addf %62, %63 : vector<16x64xf32>
    %cst_33 = arith.constant 0.000000e+00 : f32
    %65 = vector.broadcast %cst_33 : f32 to vector<16x64xf32>
    %66 = arith.maximumf %64, %65 : vector<16x64xf32>
    %c0_34 = arith.constant 0 : index
    %c0_35 = arith.constant 0 : index
    %67 = vector.load %arg4[%c0_34, %c0_35] : memref<64x32xf32, #tpu.memory_space<vmem>>, vector<64x32xf32>
    %cst_36 = arith.constant dense<0.000000e+00> : vector<16x32xf32>
    %68 = tpu.matmul %66, %67, %cst_36 {dimension_numbers = #tpu.dot_dimension_numbers<[1], [0], [0], [1], [0, 0, 1, 1], [], []>} : vector<16x64xf32>, vector<64x32xf32>, vector<16x32xf32> -> vector<16x32xf32>
    %69 = vector.broadcast %5 : vector<1x32xf32> to vector<16x32xf32>
    %70 = arith.addf %68, %69 : vector<16x32xf32>
    %71 = arith.addf %60, %70 : vector<16x32xf32>
    %cst_37 = arith.constant dense<0.000000e+00> : vector<16xf32>
    %72 = vector.multi_reduction <add>, %71, %cst_37 [1] : vector<16x32xf32> to vector<16xf32>
    %73 = vector.shape_cast %72 : vector<16xf32> to vector<16x1xf32>
    %cst_38 = arith.constant 3.200000e+01 : f32
    %74 = vector.broadcast %cst_38 : f32 to vector<16x1xf32>
    %75 = arith.divf %73, %74 : vector<16x1xf32>
    %76 = vector.broadcast %75 : vector<16x1xf32> to vector<16x32xf32>
    %77 = arith.subf %71, %76 : vector<16x32xf32>
    %78 = arith.mulf %77, %77 : vector<16x32xf32>
    %cst_39 = arith.constant dense<0.000000e+00> : vector<16xf32>
    %79 = vector.multi_reduction <add>, %78, %cst_39 [1] : vector<16x32xf32> to vector<16xf32>
    %80 = vector.shape_cast %79 : vector<16xf32> to vector<16x1xf32>
    %cst_40 = arith.constant 3.200000e+01 : f32
    %81 = vector.broadcast %cst_40 : f32 to vector<16x1xf32>
    %82 = arith.divf %80, %81 : vector<16x1xf32>
    %83 = vector.broadcast %75 : vector<16x1xf32> to vector<16x32xf32>
    %84 = arith.subf %71, %83 : vector<16x32xf32>
    %cst_41 = arith.constant 9.99999974E-6 : f32
    %85 = vector.broadcast %cst_41 : f32 to vector<16x1xf32>
    %86 = arith.addf %82, %85 : vector<16x1xf32>
    %87 = math.rsqrt %86 : vector<16x1xf32>
    %88 = vector.broadcast %87 : vector<16x1xf32> to vector<16x32xf32>
    %89 = arith.mulf %84, %88 : vector<16x32xf32>
    %90 = vector.broadcast %8 : vector<1x32xf32> to vector<16x32xf32>
    %91 = arith.mulf %89, %90 : vector<16x32xf32>
    %92 = vector.broadcast %9 : vector<1x32xf32> to vector<16x32xf32>
    %93 = arith.addf %91, %92 : vector<16x32xf32>
    %c0_42 = arith.constant 0 : index
    %c0_43 = arith.constant 0 : index
    %94 = vector.load %arg8[%c0_42, %c0_43] : memref<16x32xf32, #tpu.memory_space<vmem>>, vector<16x32xf32>
    tpu.vector_store %arg8[%c0_42, %c0_43], %93 {strides = array<i32>} : memref<16x32xf32, #tpu.memory_space<vmem>>, vector<16x32xf32>,
    return
  }
}

</mosaic_0001>

<bundles_post_ra>
// kernel: tpu_custom_call.1
= control target key start
LH: loop header
LB: loop body
LE: loop exit
PB: predicated region body
PF: predicated region fallthrough
CT: control target
= control target key end

     0   :  { %13 = vsyncpa [#allocation3], 0  ;;  %s1010_s0 = inlined_call_operand.vmem [shape: f32[16,64], index: 0, kind: input, shape index: {}]   ;;  %s1011_s1 = inlined_call_operand.vmem [shape: f32[64,96], index: 1, kind: input, shape index: {}]   ;;  %s1012_s2 = inlined_call_operand.vmem [shape: f32[32,32], index: 2, kind: input, shape index: {}]   ;;  %s1013_s3 = inlined_call_operand.vmem [shape: f32[32,64], index: 3, kind: input, shape index: {}]   ;;  %s1014_s4 = inlined_call_operand.vmem [shape: f32[64,32], index: 4, kind: input, shape index: {}]   ;;  %s1015_s5 = inlined_call_operand.hbm [shape: f32[8,96], index: 5, kind: input, shape index: {}]   ;;  %s1016_s6 = inlined_call_operand.vmem [shape: f32[64,32], index: 6, kind: input, shape index: {}]   ;;  %s1017_s7 = inlined_call_operand.vmem [shape: f32[16,64], index: 7, kind: input, shape index: {}]   ;;  %s1018_s8 = inlined_call_operand.hbm [shape: f32[16,32], index: 8, kind: output, shape index: {}]  }
   0x1   :  { %14 = vsyncpa [#allocation4], 0  ;;  %s30_s29 = sshll.u32 %s1015_s5, 4  ;;  %s718_s30 = smov [#allocation2]   ;;  %s31_s29 = int_to_ptr.hbm [resolvable:$true] %s30_s29 }
   0x2   :  { %s32_s9 = sshll.u32 %s718_s30, 4  ;;  %s33_s9 = int_to_ptr.vmem [resolvable:$true] %s32_s9 }
   0x3   :  { %35 = dma.hbm_to_vmem [thread:$0]  %s31_s29, 128, %s33_s9, [#allocation3]  }
   0x4   :  { %714 = dma.done.wait [#allocation3], 128  }
   0x5   :  { %715 = vsyncadd [#allocation3], 4294967168  ;;  %v58_v0 = vld [vmem:[%s1011_s1 + $0x38] sm:$0xff]  ;;  %v57_v1 = vld [vmem:[%s1011_s1 + $0x30] sm:$0xff]  ;;  %s719_s17 = smov 32   ;;  %vm60_vm0 = vcmask 523264  }
   0x6   :  { %75 = vmatpush.msra.mxu0 %v58_v0  ;;  %v56_v2 = vld [vmem:[%s1011_s1 + $0x28] sm:$0xff]  ;;  %v793_v4 = vld [vmem:[%s1016_s6 + $0x38] sm:$0xff]  ;;  %v55_v5 = vld [vmem:[%s1011_s1 + $0x20] sm:$0xff]  ;;  %vm194_vm1 = vcmask 261120   ;;  %s580_s10 = sshll.u32 %s1018_s8, 4  ;;  %s724_s11 = smov 128   ;;  %s581_s10 = int_to_ptr.hbm [resolvable:$true] %s580_s10 }
   0x7   :  { %v786_v3 = vld [vmem:[%s1016_s6 + $0x28] sm:$0xff]  ;;  %120 = vrot.lane.b32.xlu0 %v793_v4, %s719_s17  ;;  %325 = vmatpush.msra.mxu3 %v793_v4  ;;  %v54_v6 = vld [vmem:[%s1011_s1 + $0x18] sm:$0xff]  ;;  %v807_v7 = vld [vmem:[%s1016_s6 + $0x30] sm:$0xff] }
   0x8   :  { %76 = vmatpush.msra.mxu0 %v57_v1  ;;  %116 = vrot.lane.b32.xlu1 %v786_v3, %s719_s17  ;;  %v812_v8 = vld [vmem:[%s1016_s6 + $0x18] sm:$0xff]  ;;  %v53_v9 = vld [vmem:[%s1011_s1 + $0x10] sm:$0xff]  ;;  %v94_v10 = vld [vmem:[%s1016_s6 + $0x20] sm:$0xff] }
   0x9   :  { %112 = vrot.lane.b32.xlu2 %v812_v8, %s719_s17  ;;  %326 = vmatpush.msra.mxu3 %v807_v7  ;;  %v52_v11 = vld [vmem:[%s1011_s1 + $0x8] sm:$0xff]  ;;  %v92_v12 = vld [vmem:[%s1016_s6 + $0x10] sm:$0xff]  ;;  %v51_v13 = vld [vmem:[%s1011_s1] sm:$0xff] }
   0xa   :  { %77 = vmatpush.msra.mxu0 %v56_v2  ;;  %v840_v14 = vld [vmem:[%s1010_s0] sm:$0xff]  ;;  %v91_v15 = vld [vmem:[%s1016_s6 + $0x8] sm:$0xff] }
   0xb   :  { %327 = vmatpush.msra.mxu3 %v786_v3  ;;  %v90_v16 = vld [vmem:[%s1016_s6] sm:$0xff]  ;;  %v856_v17 = vld [vmem:[%s1010_s0 + $0x8] sm:$0xff]  ;;  %s720_s6 = smov 96   ;;  %s721_s0 = smov 64  }
   0xc   :  { %78 = vmatpush.msra.mxu0 %v55_v5  ;;  %v643_v20 = vld [vmem:[#allocation2] ss:$0 sm:$0xff] }
   0xd   :  { %328 = vmatpush.msra.mxu3 %v94_v10 }
   0xe   :  { %79 = vmatpush.msra.mxu0 %v54_v6 }
   0xf   :  { %118 = vrot.lane.b32.xlu0 %v807_v7, %s719_s17  ;;  %329 = vmatpush.msra.mxu3 %v812_v8 }
  0x10   :  { %80 = vmatpush.msra.mxu0 %v53_v9  ;;  %114 = vrot.lane.b32.xlu1 %v94_v10, %s719_s17 }
  0x11   :  { %110 = vrot.lane.b32.xlu2 %v92_v12, %s719_s17  ;;  %330 = vmatpush.msra.mxu3 %v92_v12 }
  0x12   :  { %81 = vmatpush.msra.mxu0 %v52_v11 }
  0x13   :  { %331 = vmatpush.msra.mxu3 %v91_v15 }
  0x14   :  { %82 = vmatpush.msra.mxu0 %v51_v13 }
  0x15   :  { %593 = vmatmul.msk.f32.vlgmr.msra.gmra.mxu0 %vm60_vm0, %v840_v14  ;;  %332 = vmatpush.msra.mxu3 %v90_v16 }
  0x17   :  { %108 = vrot.lane.b32.xlu0 %v91_v15, %s719_s17 }
  0x18   :  { %106 = vrot.lane.b32.xlu1 %v90_v16, %s719_s17 }
  0x1d   :  { %594 = vmatmul.msk.f32.gmra.mxu0 %vm60_vm0, %v856_v17 }
  0x63   :  { %v113_v25 = vpop.permute.xlu2 %112 }
  0x6b   :  { %v111_v32 = vpop.permute.xlu2 %110 }
  0x79   :  { %v121_v18 = vpop.permute.xlu0 %120 }
  0x7a   :  { %v117_v19 = vpop.permute.xlu1 %116 }
  0x81   :  { %v119_v22 = vpop.permute.xlu0 %118 }
  0x82   :  { %v115_v26 = vpop.permute.xlu1 %114 }
  0x89   :  { %v109_v37 = vpop.permute.xlu0 %108 }
  0x8a   :  { %v107_v33 = vpop.permute.xlu1 %106 }
  0x92   :  { %v84_v21 = vpop.f32.mrf.mxu0 }
  0x93   :  { %v860_v23 = vadd.f32 %v643_v20, %v84_v21  ;;  %v347_v21 = vld [vmem:[%s1012_s2 + $0x18] sm:$0xff] }
  0x94   :  { %367 = vmatpush.msrb.mxu0 %v347_v21 }
  0x95   :  { %v136_v24 = vmul.f32 %v119_v22, %v860_v23  ;;  %v132_v34 = vmul.f32 %v111_v32, %v860_v23  ;;  %v134_v35 = vmul.f32 %v115_v26, %v860_v23  ;;  %v130_v36 = vmul.f32 %v107_v33, %v860_v23  ;;  %v346_v22 = vld [vmem:[%s1012_s2 + $0x10] sm:$0xff]  ;;  %v253_v32 = vld [vmem:[%s1017_s7 + $0x8] sm:$0xff] }
  0x96   :  { %368 = vmatpush.msrb.mxu0 %v346_v22 }
  0x97   :  { %190 = vrot.lane.b32.xlu0 %v136_v24, %s720_s6 }
  0x9a   :  { %v87_v27 = vpop.f32.mrf.mxu0 }
  0x9b   :  { %v864_v28 = vadd.f32 %v643_v20, %v87_v27 }
  0x9d   :  { %v137_v29 = vmul.f32 %v121_v18, %v864_v28  ;;  %v135_v30 = vmul.f32 %v117_v19, %v864_v28  ;;  %v133_v31 = vmul.f32 %v113_v25, %v864_v28  ;;  %v131_v38 = vmul.f32 %v109_v37, %v864_v28 }
  0x9f   :  { %192 = vrot.lane.b32.xlu2 %v137_v29, %s720_s6  ;;  %188 = vrot.lane.b32.xlu1 %v135_v30, %s720_s6 }
  0xa0   :  { %184 = vrot.lane.b32.xlu0 %v133_v31, %s720_s6 }
  0xa7   :  { %186 = vrot.lane.b32.xlu2 %v134_v35, %s720_s6  ;;  %182 = vrot.lane.b32.xlu1 %v132_v34, %s720_s6  ;;  %v345_v35 = vld [vmem:[%s1012_s2 + $0x8] sm:$0xff] }
  0xa8   :  { %178 = vrot.lane.b32.xlu0 %v130_v36, %s720_s6  ;;  %v344_v36 = vld [vmem:[%s1012_s2] sm:$0xff]  ;;  %369 = vmatpush.msrb.mxu0 %v345_v35  ;;  %s725_s2 = smov 8  }
  0xaa   :  { %370 = vmatpush.msrb.mxu0 %v344_v36 }
  0xaf   :  { %180 = vrot.lane.b32.xlu2 %v131_v38, %s720_s6  ;;  %152 = vrot.lane.b32.xlu1 %v793_v4, %s721_s0 }
  0xb0   :  { %148 = vrot.lane.b32.xlu0 %v786_v3, %s721_s0 }
  0xb7   :  { %150 = vrot.lane.b32.xlu2 %v807_v7, %s721_s0  ;;  %146 = vrot.lane.b32.xlu1 %v94_v10, %s721_s0 }
  0xb8   :  { %142 = vrot.lane.b32.xlu0 %v92_v12, %s721_s0 }
  0xbf   :  { %144 = vrot.lane.b32.xlu2 %v812_v8, %s721_s0  ;;  %140 = vrot.lane.b32.xlu1 %v91_v15, %s721_s0 }
  0xc7   :  { %138 = vrot.lane.b32.xlu2 %v90_v16, %s721_s0 }
  0xf9   :  { %v193_v39 = vpop.permute.xlu2 %192 }
  0xfa   :  { %595 = vmatpush.xpose.msk.msra.mxu1 %vm194_vm1, %v193_v39 }
 0x101   :  { %v187_v41 = vpop.permute.xlu2 %186 }
 0x109   :  { %v191_v40 = vpop.permute.xlu0 %190  ;;  %v181_v44 = vpop.permute.xlu2 %180 }
 0x10a   :  { %596 = vmatpush.xpose.msk.msra.mxu1 %vm194_vm1, %v191_v40 }
 0x111   :  { %v189_v42 = vpop.permute.xlu1 %188  ;;  %v151_v47 = vpop.permute.xlu2 %150 }
 0x112   :  { %v185_v43 = vpop.permute.xlu0 %184  ;;  %597 = vmatpush.xpose.msk.msra.mxu1 %vm194_vm1, %v189_v42  ;;  %v168_v49 = vmul.f32 %v151_v47, %v860_v23 }
 0x116   :  { %598 = vmatpush.xpose.msk.msra.mxu1 %vm194_vm1, %v187_v41 }
 0x119   :  { %v183_v45 = vpop.permute.xlu1 %182  ;;  %v145_v57 = vpop.permute.xlu2 %144 }
 0x11a   :  { %v179_v46 = vpop.permute.xlu0 %178  ;;  %599 = vmatpush.xpose.msk.msra.mxu1 %vm194_vm1, %v185_v43  ;;  %v165_v60 = vmul.f32 %v145_v57, %v864_v28 }
 0x11e   :  { %600 = vmatpush.xpose.msk.msra.mxu1 %vm194_vm1, %v183_v45  ;;  %v644_v45 = vld [vmem:[#allocation2 + $0x2] ss:$0 sm:$0xff] }
 0x121   :  { %v153_v48 = vpop.permute.xlu1 %152  ;;  %v139_v63 = vpop.permute.xlu2 %138 }
 0x122   :  { %v169_v50 = vmul.f32 %v153_v48, %v864_v28  ;;  %601 = vmatpush.xpose.msk.msra.mxu1 %vm194_vm1, %v181_v44  ;;  %v149_v51 = vpop.permute.xlu0 %148  ;;  %v162_v1 = vmul.f32 %v139_v63, %v860_v23 }
 0x123   :  { %v167_v54 = vmul.f32 %v149_v51, %v864_v28 }
 0x124   :  { %v623_v52 = vpack.i.bf16 %v168_v49, %v169_v50 }
 0x126   :  { %624 = vrot.lane.b32.xlu1 %v623_v52, %s721_s0  ;;  %602 = vmatpush.xpose.msk.msra.mxu1 %vm194_vm1, %v179_v46 }
 0x129   :  { %v147_v53 = vpop.permute.xlu1 %146  ;;  %603 = vmatmul.msk.f32.vlgmr.msra.gmra.mxu1 %vm194_vm1, %v860_v23 }
 0x12a   :  { %v166_v55 = vmul.f32 %v147_v53, %v860_v23  ;;  %v143_v58 = vpop.permute.xlu0 %142 }
 0x12b   :  { %v164_v59 = vmul.f32 %v143_v58, %v860_v23 }
 0x12c   :  { %v628_v56 = vpack.i.bf16 %v166_v55, %v167_v54  ;;  %v722_v54 = vmov 32.0  }
 0x12d   :  { %v633_v61 = vpack.i.bf16 %v164_v59, %v165_v60 }
 0x12e   :  { %629 = vrot.lane.b32.xlu1 %v628_v56, %s721_s0 }
 0x131   :  { %604 = vmatmul.msk.f32.gmra.mxu1 %vm194_vm1, %v864_v28  ;;  %v141_v62 = vpop.permute.xlu1 %140 }
 0x132   :  { %v163_v0 = vmul.f32 %v141_v62, %v864_v28  ;;  %v252_v28 = vld [vmem:[%s1017_s7] sm:$0xff] }
 0x134   :  { %v638_v2 = vpack.i.bf16 %v162_v1, %v163_v0 }
 0x136   :  { %634 = vrot.lane.b32.xlu1 %v633_v61, %s721_s0 }
 0x13e   :  { %639 = vrot.lane.b32.xlu1 %v638_v2, %s721_s0 }
 0x198   :  { %v625_v3 = vpop.permute.xlu1 %624 }
 0x199   :  { %v626_v4 = vunpack.i.l.bf16 %v625_v3  ;;  %v627_v5 = vunpack.i.h.bf16 %v625_v3 }
 0x19b   :  { %302 = vmatpush.msra.mxu2 %v626_v4 }
 0x19d   :  { %303 = vmatpush.msra.mxu2 %v627_v5  ;;  %v645_v5 = vld [vmem:[#allocation2 + $0x3] ss:$0 sm:$0xff] }
 0x1a0   :  { %v630_v6 = vpop.permute.xlu1 %629 }
 0x1a1   :  { %v631_v7 = vunpack.i.l.bf16 %v630_v6  ;;  %v632_v8 = vunpack.i.h.bf16 %v630_v6  ;;  %v443_v6 = vld [vmem:[%s1013_s3 + $0x18] sm:$0xff] }
 0x1a3   :  { %304 = vmatpush.msra.mxu2 %v631_v7  ;;  %v442_v7 = vld [vmem:[%s1013_s3 + $0x10] sm:$0xff] }
 0x1a5   :  { %305 = vmatpush.msra.mxu2 %v632_v8  ;;  %v441_v8 = vld [vmem:[%s1013_s3 + $0x8] sm:$0xff] }
 0x1a6   :  { %v234_v9 = vpop.f32.mrf.mxu1 }
 0x1a7   :  { %v240_v10 = vsel %vm60_vm0, %v234_v9, -inf }
 0x1a8   :  { %241 = vmax.xlane.f32.xlu0 %v240_v10  ;;  %v635_v11 = vpop.permute.xlu1 %634 }
 0x1a9   :  { %v636_v12 = vunpack.i.l.bf16 %v635_v11  ;;  %v637_v13 = vunpack.i.h.bf16 %v635_v11 }
 0x1ab   :  { %306 = vmatpush.msra.mxu2 %v636_v12 }
 0x1ad   :  { %307 = vmatpush.msra.mxu2 %v637_v13  ;;  %v483_v13 = vld [vmem:[%s1014_s4 + $0x38] sm:$0xff] }
 0x1ae   :  { %v237_v15 = vpop.f32.mrf.mxu1  ;;  %502 = vmatpush.msrb.mxu3 %v483_v13 }
 0x1af   :  { %v243_v16 = vsel %vm60_vm0, %v237_v15, -inf }
 0x1b0   :  { %244 = vmax.xlane.f32.xlu2 %v243_v16  ;;  %v640_v18 = vpop.permute.xlu1 %639  ;;  %v481_v16 = vld [vmem:[%s1014_s4 + $0x28] sm:$0xff] }
 0x1b1   :  { %v641_v19 = vunpack.i.l.bf16 %v640_v18  ;;  %v642_v20 = vunpack.i.h.bf16 %v640_v18 }
 0x1b3   :  { %308 = vmatpush.msra.mxu2 %v641_v19 }
 0x1b5   :  { %309 = vmatpush.msra.mxu2 %v642_v20  ;;  %v480_v20 = vld [vmem:[%s1014_s4 + $0x20] sm:$0xff] }
 0x1b7   :  { %463 = vmatpush.msrb.mxu2 %v443_v6 }
 0x1b9   :  { %464 = vmatpush.msrb.mxu2 %v442_v7 }
 0x1bb   :  { %465 = vmatpush.msrb.mxu2 %v441_v8  ;;  %v647_v8 = vld [vmem:[#allocation2 + $0x4] ss:$0 sm:$0xff] }
 0x21b   :  { %v242_v23 = vpop.xlane.xlu0 %241 }
 0x21c   :  { %v246_v24 = vsub.f32 %v234_v9, %v242_v23  ;;  %v440_v9 = vld [vmem:[%s1013_s3] sm:$0xff]  ;;  %v479_v23 = vld [vmem:[%s1014_s4 + $0x18] sm:$0xff] }
 0x21d   :  { %466 = vmatpush.msrb.mxu2 %v440_v9 }
 0x21e   :  { %v248_v25 = vmul.f32 1.442695, %v246_v24 }
 0x220   :  { %648 = vpow2.f32 %v248_v25  ;;  %v478_v25 = vld [vmem:[%s1014_s4 + $0x10] sm:$0xff] }
 0x223   :  { %v245_v26 = vpop.xlane.xlu2 %244 }
 0x224   :  { %v247_v27 = vsub.f32 %v237_v15, %v245_v26  ;;  %v482_v15 = vld [vmem:[%s1014_s4 + $0x30] sm:$0xff] }
 0x225   :  { %503 = vmatpush.msrb.mxu3 %v482_v15 }
 0x226   :  { %v649_v29 = vpop.eup %648  ;;  %v250_v30 = vmul.f32 1.442695, %v247_v27 }
 0x227   :  { %v254_v31 = vmul.f32 %v649_v29, %v252_v28  ;;  %504 = vmatpush.msrb.mxu3 %v481_v16 }
 0x228   :  { %650 = vpow2.f32 %v250_v30 }
 0x229   :  { %605 = vmatmul.msk.f32.vlgmr.msra.gmra.mxu2 %vm60_vm0, %v254_v31  ;;  %607 = vmatmul.msk.f32.vlgmr.msra.gmra.mxu3 %vm60_vm0, %v254_v31 }
 0x22a   :  { %505 = vmatpush.msrb.mxu3 %v480_v20 }
 0x22c   :  { %506 = vmatpush.msrb.mxu3 %v479_v23 }
 0x22e   :  { %v651_v33 = vpop.eup %650  ;;  %507 = vmatpush.msrb.mxu3 %v478_v25 }
 0x22f   :  { %v255_v34 = vmul.f32 %v651_v33, %v253_v32 }
 0x231   :  { %606 = vmatmul.msk.f32.gmra.mxu2 %vm60_vm0, %v255_v34  ;;  %608 = vmatmul.msk.f32.gmra.mxu3 %vm60_vm0, %v255_v34 }
 0x2ac   :  { %v334_v37 = vpop.f32.mrf.mxu3  ;;  %v311_v38 = vpop.f32.mrf.mxu2 }
 0x2ad   :  { %652 = vrcp.f32 %v334_v37 }
 0x2b3   :  { %v653_v39 = vpop.eup %652 }
 0x2b4   :  { %v337_v40 = vpop.f32.mrf.mxu3  ;;  %v342_v41 = vmul.f32 %v653_v39, %v311_v38  ;;  %v314_v43 = vpop.f32.mrf.mxu2 }
 0x2b5   :  { %654 = vrcp.f32 %v337_v40 }
 0x2b6   :  { %609 = vmatmul.msk.f32.vlgmr.msrb.gmra.mxu0 %vm194_vm1, %v342_v41  ;;  %656 = vrcp.f32 %v722_v54 }
 0x2bb   :  { %v655_v42 = vpop.eup %654 }
 0x2bc   :  { %v343_v44 = vmul.f32 %v655_v42, %v314_v43  ;;  %v657_v55 = vpop.eup %656 }
 0x2bd   :  { %v387_v56 = vmul.f32 32.0, %v657_v55  ;;  %vm391_vm2 = vweird.f32 %v657_v55 }
 0x2be   :  { %610 = vmatmul.msk.f32.gmra.mxu0 %vm194_vm1, %v343_v44 }
 0x2bf   :  { %v388_v57 = vsub.f32 1.0, %v387_v56 }
 0x2c1   :  { %v389_v58 = vmul.f32 %v657_v55, %v388_v57 }
 0x2c3   :  { %v390_v59 = vadd.f32 %v657_v55, %v389_v58 }
 0x2c5   :  { %v946_v60 = vsel %vm391_vm2, %v657_v55, %v390_v59 }
 0x333   :  { %v372_v46 = vpop.f32.mrf.mxu0 }
 0x334   :  { %v373_v47 = vadd.f32 %v644_v45, %v372_v46  ;;  %v476_v46 = vld [vmem:[%s1014_s4] sm:$0xff] }
 0x336   :  { %v378_v48 = vadd.f32 %v373_v47, %v840_v14  ;;  %v646_v47 = vld [vmem:[#allocation2 + $0x1] ss:$0 sm:$0xff] }
 0x338   :  { %v380_v49 = vsel %vm194_vm1, %v378_v48, 0.0 }
 0x339   :  { %381 = vadd.xlane.f32.xlu1 %v380_v49 }
 0x33b   :  { %v375_v50 = vpop.f32.mrf.mxu0 }
 0x33c   :  { %v376_v51 = vadd.f32 %v644_v45, %v375_v50 }
 0x33e   :  { %v379_v52 = vadd.f32 %v376_v51, %v856_v17 }
 0x340   :  { %v383_v53 = vsel %vm194_vm1, %v379_v52, 0.0 }
 0x341   :  { %384 = vadd.xlane.f32.xlu2 %v383_v53 }
 0x3ac   :  { %v382_v14 = vpop.xlane.xlu1 %381 }
 0x3ad   :  { %v393_v61 = vmul.f32 %v946_v60, %v382_v14 }
 0x3af   :  { %v395_v62 = vsub.f32 %v378_v48, %v393_v61 }
 0x3b1   :  { %v397_v63 = vmul.f32 %v395_v62, %v395_v62 }
 0x3b3   :  { %v399_v17 = vsel %vm194_vm1, %v397_v63, 0.0 }
 0x3b4   :  { %400 = vadd.xlane.f32.xlu0 %v399_v17  ;;  %v385_v0 = vpop.xlane.xlu2 %384 }
 0x3b5   :  { %v394_v1 = vmul.f32 %v946_v60, %v385_v0 }
 0x3b7   :  { %v396_v2 = vsub.f32 %v379_v52, %v394_v1 }
 0x3b9   :  { %v398_v3 = vmul.f32 %v396_v2, %v396_v2 }
 0x3bb   :  { %v402_v4 = vsel %vm194_vm1, %v398_v3, 0.0 }
 0x3bc   :  { %403 = vadd.xlane.f32.xlu2 %v402_v4 }
 0x3c8   :  { %435 = vrot.lane.b32.xlu0 %v645_v5, %s720_s6 }
 0x3d4   :  { %485 = vrot.lane.b32.xlu2 %v644_v45, %s720_s6  ;;  %v477_v45 = vld [vmem:[%s1014_s4 + $0x8] sm:$0xff]  ;;  %s723_s4 = smov [#allocation5]  }
 0x3d5   :  { %508 = vmatpush.msrb.mxu3 %v477_v45 }
 0x3d7   :  { %509 = vmatpush.msrb.mxu3 %v476_v46 }
 0x427   :  { %v401_v10 = vpop.xlane.xlu0 %400 }
 0x428   :  { %v405_v11 = vmul.f32 %v401_v10, %v946_v60 }
 0x42a   :  { %v407_v12 = vadd.f32 1e-05, %v405_v11 }
 0x42c   :  { %658 = vrsqrt.f32 %v407_v12  ;;  %vm415_vm4 = vweird.f32 %v407_v12 }
 0x42f   :  { %v404_v18 = vpop.xlane.xlu2 %403 }
 0x430   :  { %v406_v19 = vmul.f32 %v404_v18, %v946_v60 }
 0x432   :  { %v659_v21 = vpop.eup %658  ;;  %v408_v22 = vadd.f32 1e-05, %v406_v19 }
 0x433   :  { %v410_v24 = vmul.f32 %v659_v21, %v407_v12  ;;  %vm416_vm3 = vweird.f32 %v659_v21 }
 0x434   :  { %660 = vrsqrt.f32 %v408_v22  ;;  %vm417_vm5 = vmor %vm415_vm4, %vm416_vm3  ;;  %vm425_vm7 = vweird.f32 %v408_v22 }
 0x435   :  { %v411_v26 = vmul.f32 %v659_v21, %v410_v24 }
 0x437   :  { %v412_v27 = vmul.f32 0.5, %v411_v26  ;;  %v486_v54 = vpop.permute.xlu2 %485 }
 0x439   :  { %v413_v28 = vsub.f32 1.5, %v412_v27 }
 0x43a   :  { %v661_v29 = vpop.eup %660  ;;  %v436_v36 = vpop.permute.xlu0 %435 }
 0x43b   :  { %v414_v30 = vmul.f32 %v659_v21, %v413_v28  ;;  %v420_v31 = vmul.f32 %v661_v29, %v408_v22  ;;  %vm426_vm6 = vweird.f32 %v661_v29 }
 0x43c   :  { %vm427_vm8 = vmor %vm425_vm7, %vm426_vm6 }
 0x43d   :  { %v421_v32 = vmul.f32 %v661_v29, %v420_v31  ;;  %v418_v33 = vsel %vm417_vm5, %v659_v21, %v414_v30 }
 0x43e   :  { %v429_v34 = vmul.f32 %v418_v33, %v395_v62 }
 0x43f   :  { %v422_v35 = vmul.f32 0.5, %v421_v32 }
 0x440   :  { %v432_v37 = vmul.f32 %v645_v5, %v429_v34 }
 0x441   :  { %v423_v38 = vsub.f32 1.5, %v422_v35 }
 0x442   :  { %v438_v39 = vadd.f32 %v436_v36, %v432_v37 }
 0x443   :  { %v424_v40 = vmul.f32 %v661_v29, %v423_v38 }
 0x444   :  { %611 = vmatmul.msk.f32.vlgmr.msrb.gmra.mxu2 %vm194_vm1, %v438_v39 }
 0x445   :  { %v428_v41 = vsel %vm427_vm8, %v661_v29, %v424_v40 }
 0x446   :  { %v430_v42 = vmul.f32 %v428_v41, %v396_v2 }
 0x448   :  { %v433_v43 = vmul.f32 %v645_v5, %v430_v42 }
 0x44a   :  { %v439_v44 = vadd.f32 %v436_v36, %v433_v43 }
 0x44c   :  { %612 = vmatmul.msk.f32.gmra.mxu2 %vm194_vm1, %v439_v44 }
 0x4c7   :  { %v468_v48 = vpop.f32.mrf.mxu2 }
 0x4c8   :  { %v469_v49 = vadd.f32 %v646_v47, %v468_v48 }
 0x4ca   :  { %v474_v50 = vmax.f32 %v469_v49, 0.0 }
 0x4cc   :  { %613 = vmatmul.msk.f32.vlgmr.msrb.gmra.mxu3 %vm60_vm0, %v474_v50 }
 0x4cf   :  { %v471_v51 = vpop.f32.mrf.mxu2 }
 0x4d0   :  { %v472_v52 = vadd.f32 %v646_v47, %v471_v51 }
 0x4d2   :  { %v475_v53 = vmax.f32 %v472_v52, 0.0 }
 0x4d4   :  { %614 = vmatmul.msk.f32.gmra.mxu3 %vm60_vm0, %v475_v53 }
 0x54f   :  { %v511_v55 = vpop.f32.mrf.mxu3 }
 0x550   :  { %v512_v56 = vadd.f32 %v511_v55, %v486_v54 }
 0x552   :  { %v517_v57 = vadd.f32 %v512_v56, %v438_v39 }
 0x554   :  { %v519_v58 = vsel %vm194_vm1, %v517_v57, 0.0 }
 0x555   :  { %520 = vadd.xlane.f32.xlu0 %v519_v58 }
 0x557   :  { %v514_v59 = vpop.f32.mrf.mxu3 }
 0x558   :  { %v515_v14 = vadd.f32 %v514_v59, %v486_v54 }
 0x55a   :  { %v518_v61 = vadd.f32 %v515_v14, %v439_v44 }
 0x55c   :  { %v522_v62 = vsel %vm194_vm1, %v518_v61, 0.0 }
 0x55d   :  { %523 = vadd.xlane.f32.xlu1 %v522_v62 }
 0x5c8   :  { %v521_v63 = vpop.xlane.xlu0 %520 }
 0x5c9   :  { %v525_v17 = vmul.f32 %v521_v63, %v946_v60 }
 0x5cb   :  { %v527_v0 = vsub.f32 %v517_v57, %v525_v17 }
 0x5cd   :  { %v529_v1 = vmul.f32 %v527_v0, %v527_v0 }
 0x5cf   :  { %v531_v2 = vsel %vm194_vm1, %v529_v1, 0.0 }
 0x5d0   :  { %v524_v3 = vpop.xlane.xlu1 %523  ;;  %532 = vadd.xlane.f32.xlu2 %v531_v2 }
 0x5d1   :  { %v526_v4 = vmul.f32 %v524_v3, %v946_v60 }
 0x5d3   :  { %v528_v5 = vsub.f32 %v518_v61, %v526_v4 }
 0x5d5   :  { %v530_v6 = vmul.f32 %v528_v5, %v528_v5 }
 0x5d7   :  { %v534_v7 = vsel %vm194_vm1, %v530_v6, 0.0 }
 0x5d8   :  { %535 = vadd.xlane.f32.xlu1 %v534_v7 }
 0x5f1   :  { %567 = vrot.lane.b32.xlu1 %v647_v8, %s720_s6  ;;  %s578_s6 = sshll.u32 %s723_s4, 4  ;;  %s579_s6 = int_to_ptr.vmem [resolvable:$true] %s578_s6 }
 0x643   :  { %v533_v9 = vpop.xlane.xlu2 %532 }
 0x644   :  { %v537_v10 = vmul.f32 %v533_v9, %v946_v60 }
 0x646   :  { %v539_v11 = vadd.f32 1e-05, %v537_v10 }
 0x648   :  { %662 = vrsqrt.f32 %v539_v11  ;;  %vm547_vm10 = vweird.f32 %v539_v11 }
 0x64b   :  { %v536_v12 = vpop.xlane.xlu1 %535 }
 0x64c   :  { %v538_v13 = vmul.f32 %v536_v12, %v946_v60 }
 0x64e   :  { %v663_v15 = vpop.eup %662  ;;  %v540_v16 = vadd.f32 1e-05, %v538_v13 }
 0x64f   :  { %v542_v18 = vmul.f32 %v663_v15, %v539_v11  ;;  %vm548_vm9 = vweird.f32 %v663_v15 }
 0x650   :  { %664 = vrsqrt.f32 %v540_v16  ;;  %vm549_vm11 = vmor %vm547_vm10, %vm548_vm9  ;;  %vm557_vm13 = vweird.f32 %v540_v16 }
 0x651   :  { %v543_v19 = vmul.f32 %v663_v15, %v542_v18 }
 0x653   :  { %v544_v20 = vmul.f32 0.5, %v543_v19 }
 0x655   :  { %v545_v21 = vsub.f32 1.5, %v544_v20 }
 0x656   :  { %v665_v22 = vpop.eup %664 }
 0x657   :  { %v552_v23 = vmul.f32 %v665_v22, %v540_v16  ;;  %v546_v24 = vmul.f32 %v663_v15, %v545_v21  ;;  %vm558_vm12 = vweird.f32 %v665_v22 }
 0x658   :  { %vm559_vm14 = vmor %vm557_vm13, %vm558_vm12 }
 0x659   :  { %v553_v25 = vmul.f32 %v665_v22, %v552_v23  ;;  %v550_v27 = vsel %vm549_vm11, %v663_v15, %v546_v24 }
 0x65a   :  { %v561_v29 = vmul.f32 %v550_v27, %v527_v0 }
 0x65b   :  { %v554_v26 = vmul.f32 0.5, %v553_v25 }
 0x65c   :  { %v564_v32 = vmul.f32 %v647_v8, %v561_v29 }
 0x65d   :  { %v555_v28 = vsub.f32 1.5, %v554_v26 }
 0x65f   :  { %v556_v60 = vmul.f32 %v665_v22, %v555_v28 }
 0x661   :  { %v560_v30 = vsel %vm559_vm14, %v665_v22, %v556_v60 }
 0x662   :  { %v562_v31 = vmul.f32 %v560_v30, %v528_v5 }
 0x663   :  { %v568_v33 = vpop.permute.xlu1 %567 }
 0x664   :  { %v565_v34 = vmul.f32 %v647_v8, %v562_v31  ;;  %v570_v35 = vadd.f32 %v568_v33, %v564_v32 }
 0x666   :  { %v571_v36 = vadd.f32 %v568_v33, %v565_v34  ;;  %572 = vst.msk [vmem:[#allocation5] sm:$0xff] %vm194_vm1, %v570_v35 }
 0x668   :  { %573 = vst.msk [vmem:[#allocation5 + $0x8] sm:$0xff] %vm194_vm1, %v571_v36 }
 0x669   :  { %586 = dma.vmem_to_hbm [thread:$0]  %s579_s6, 256, %s581_s10, [#allocation4], %s724_s11, %s724_s11, %s725_s2  }
 0x66a   :  { %716 = dma.done.wait [#allocation4], 256  }
 0x66b   :  { %717 = vsyncadd [#allocation4], 4294967040 }
 0x66c   :  { %591 = vsyncpa [#allocation3], 1 }
 0x66d   :  { %592 = vsyncpa [#allocation4], 1 }

</bundles_post_ra>
